<compile_context>
chip_gen: v7x
topology: tpu7x:2x2x1
jax: 0.10.0
libtpu: 0.0.40
codegen_flags: <defaults>
</compile_context>

<pallas_src>
import functools

import jax
import jax.numpy as jnp
from jax import lax
from jax.experimental import pallas as pl
from jax.experimental.pallas import tpu as pltpu

LANES = 128


def _round_up(x, m):
    return ((x + m - 1) // m) * m


def _reaction_kernel(scale_ref, shift_ref, an_ref, bounds_ref, ni_ref,   # SMEM scalars
                     e_ref, el_ref,                                       # VMEM atom tiles
                     mask_ref, energy_ref,                                # outputs
                     *, n_species, n_struct, block_rows, blocks_per_core):
    core = pl.program_id(0)
    step = pl.program_id(1)
    blk = core * blocks_per_core + step
    blk_lo = blk * (block_rows * LANES)          # first global atom index in this block
    blk_hi = blk_lo + block_rows * LANES

    # Zero the per-core resident energy accumulator on the first atom block.
    @pl.when(step == 0)
    def _():
        energy_ref[...] = jnp.zeros_like(energy_ref)

    e = e_ref[...]                               # (block_rows, 128) f32, padded slots -> 0
    el = el_ref[...].astype(jnp.int32)           # (block_rows, 128) from int8 stream

    # --- PerSpeciesScaleShift via VPU compare+select against SMEM atomic numbers ---
    scale_at = jnp.zeros_like(e)
    shift_at = jnp.zeros_like(e)
    for s in range(n_species):
        hit = el == an_ref[s]
        scale_at = jnp.where(hit, scale_ref[s], scale_at)
        shift_at = jnp.where(hit, shift_ref[s], shift_at)
    e_scaled = scale_at * e + shift_at           # padded / unknown elements -> 0

    # --- Global atom index of every (sublane, lane) slot (int32 throughout) ---
    row = lax.broadcasted_iota(jnp.int32, e.shape, 0)
    lane = lax.broadcasted_iota(jnp.int32, e.shape, 1)
    idx = (blk * block_rows + row) * LANES + lane

    mask_ref[...] = jnp.zeros_like(mask_ref)     # lane-dense int8 store

    # --- Per-structure segment-sum + subgraph mask, scalar-guarded per structure ---
    for d in range(n_struct):
        start_d = bounds_ref[d]
        seg_end_d = bounds_ref[d + 1]            # batch is sorted: structure d = [start, end)
        mask_end_d = start_d + ni_ref[d]

        @pl.when(jnp.logical_and(start_d < blk_hi, seg_end_d > blk_lo))
        def _():
            in_seg = jnp.logical_and(idx >= start_d, idx < seg_end_d)
            contrib = jnp.where(in_seg, e_scaled, 0.0).sum(axis=0, keepdims=True)  # (1,128)
            energy_ref[pl.ds(d, 1), :] += contrib        # direct row accumulate

        @pl.when(jnp.logical_and(start_d < blk_hi, mask_end_d > blk_lo))
        def _():
            in_mask = jnp.logical_and(idx >= start_d, idx < mask_end_d)
            mask_ref[...] = jnp.where(in_mask, jnp.int8(1), mask_ref[...])


def base_reaction_forward(e_atom, elems, batch, n_atoms_i, atomic_numbers,
                          scale, shift, n_struct, *, n_cores=1, block_rows_cap=2048):
    """Wrapper: lane-dense packing, structure bounds, tiling, pallas_call.

    n_cores: set to 2 on v7x (dual TensorCore); keep 1 on v5e/v6e.
    block_rows_cap: raise to 4096 on v7x if the grid-step overhead shows up in xprof.
    """
    A = int(e_atom.shape[0])
    S = int(atomic_numbers.shape[0])
    n_struct = int(n_struct)

    # --- Tiling: atoms lane-dense (rows, 128); atom-axis grid; optional core split ---
    rows_needed = -(-A // LANES)
    block_rows = min(int(block_rows_cap), _round_up(rows_needed, 32))  # x32: int8 tile rule
    total_blocks = -(-rows_needed // block_rows)
    n_cores = max(1, min(int(n_cores), total_blocks))
    total_blocks = _round_up(total_blocks, n_cores)
    blocks_per_core = total_blocks // n_cores
    R_total = total_blocks * block_rows
    A_pad = R_total * LANES
    B_rows = _round_up(max(n_struct, 1), 8)      # structures on sublanes

    # Structure bounds from sortedness of `batch`. Empty structures get an empty mask
    # range (matches torch.unique(batch) skipping absent structures in the reference).
    batch_i32 = batch.astype(jnp.int32)
    bounds = jnp.searchsorted(
        batch_i32, jnp.arange(n_struct + 1, dtype=jnp.int32)).astype(jnp.int32)
    counts = bounds[1:] - bounds[:-1]
    ni = jnp.where(counts > 0, n_atoms_i.astype(jnp.int32), 0).astype(jnp.int32)

    def pack(x, fill, dtype):
        x = x.astype(dtype)
        return jnp.pad(x, (0, A_pad - A), constant_values=fill).reshape(R_total, LANES)

    e2 = pack(e_atom, 0.0, jnp.float32)
    el2 = pack(elems, 0, jnp.int8)   # atomic numbers >= 1, so fill 0 matches no species
    # TODO(synk): elements not present in atomic_numbers silently get scale=0, shift=0
    # (zero energy contribution); the torch model would raise/index differently.

    kernel = functools.partial(_reaction_kernel, n_species=S, n_struct=n_struct,
                               block_rows=block_rows, blocks_per_core=blocks_per_core)

    smem = pl.BlockSpec(memory_space=pltpu.MemorySpace.SMEM)
    atom_spec = pl.BlockSpec((block_rows, LANES),
                             lambda c, i: (c * blocks_per_core + i, 0))

    mask_pad, energy_part = pl.pallas_call(
        kernel,
        out_shape=(jax.ShapeDtypeStruct((R_total, LANES), jnp.int8),
                   jax.ShapeDtypeStruct((n_cores, B_rows, LANES), jnp.float32)),
        grid=(n_cores, blocks_per_core),
        in_specs=[smem, smem, smem, smem, smem, atom_spec, atom_spec],
        out_specs=(atom_spec,
                   pl.BlockSpec((None, B_rows, LANES), lambda c, i: (c, 0, 0))),
        compiler_params=pltpu.CompilerParams(
            dimension_semantics=("parallel", "arbitrary")),
    )(scale.astype(jnp.float32), shift.astype(jnp.float32),
      atomic_numbers.astype(jnp.int32), bounds, ni, e2, el2)

    energy = energy_part.sum(axis=(0, 2))[:n_struct]     # (N,) per-structure energies
    mask = mask_pad.reshape(-1)[:A].astype(jnp.bool_)    # (A,) subgraph mask
    return energy, mask


# TODO(synk): checkpoint loading (`load`), registry/config plumbing and the abstract
# `forward` of subclasses have no Pallas equivalent and are intentionally not modeled.

if __name__ == "__main__":
    key = jax.random.PRNGKey(0)
    species = ["H", "C", "N", "O"]
    atomic_numbers = jnp.array([1, 6, 7, 8], dtype=jnp.int32)  # canonicalized + sorted
    n_species = len(species)
    n_struct = 2
    counts = [6, 10]
    A = sum(counts)

    k1, k2 = jax.random.split(key, 2)
    e_atom = jax.random.normal(k1, (A,), dtype=jnp.float32)        # per-atom energies
    elems = atomic_numbers[jax.random.randint(k2, (A,), 0, n_species)]
    batch = jnp.concatenate(
        [jnp.full((c,), i, dtype=jnp.int32) for i, c in enumerate(counts)])
    n_atoms_i = jnp.array([3, 5], dtype=jnp.int32)

    # Deterministic PerSpeciesScaleShift parameters (one scale/shift per species).
    scale = 1.0 + 0.1 * jnp.arange(n_species, dtype=jnp.float32)
    shift = 0.01 * jnp.arange(n_species, dtype=jnp.float32)

    energy, mask = base_reaction_forward(
        e_atom, elems, batch, n_atoms_i, atomic_numbers, scale, shift, n_struct)
    jax.block_until_ready((energy, mask))

    # ---- plain-JAX reference ----
    sp_idx = jnp.searchsorted(atomic_numbers, elems)
    e_scaled = scale[sp_idx] * e_atom + shift[sp_idx]
    ref_energy = jax.ops.segment_sum(e_scaled, batch, num_segments=n_struct)
    starts = jnp.argmax(
        batch[None, :] == jnp.arange(n_struct, dtype=batch.dtype)[:, None], axis=1)
    idx = jnp.arange(A)
    ref_mask = jnp.any(
        (idx[:, None] >= starts[None, :]) &
        (idx[:, None] < (starts + n_atoms_i)[None, :]), axis=1)

    assert jnp.allclose(energy, ref_energy, atol=1e-5, rtol=1e-5), (energy, ref_energy)
    assert jnp.array_equal(mask, ref_mask), (mask, ref_mask)
    print("KERNEL_OK")
</pallas_src>

<mosaic_0001>
module attributes {stable_mosaic.version = 11 : i64} {
  func.func @_reaction_kernel(%arg0: i32, %arg1: i32, %arg2: memref<4xf32, #tpu.memory_space<smem>>, %arg3: memref<4xf32, #tpu.memory_space<smem>>, %arg4: memref<4xi32, #tpu.memory_space<smem>>, %arg5: memref<3xi32, #tpu.memory_space<smem>>, %arg6: memref<2xi32, #tpu.memory_space<smem>>, %arg7: memref<32x128xf32, #tpu.memory_space<vmem>>, %arg8: memref<32x128xi8, #tpu.memory_space<vmem>>, %arg9: memref<32x128xi8, #tpu.memory_space<vmem>>, %arg10: memref<1x8x128xf32, #tpu.memory_space<vmem>>) attributes {dimension_semantics = [#tpu.dimension_semantics<parallel>, #tpu.dimension_semantics<arbitrary>], iteration_bounds = array<i64: 1, 1>, scalar_prefetch = 0 : i64, scratch_operands = 0 : i64, tpu.core_type = #tpu.core_type<tc>, window_params = [{transform_indices = @transform_0, window_bounds = array<i64: 4>}, {transform_indices = @transform_1, window_bounds = array<i64: 4>}, {transform_indices = @transform_2, window_bounds = array<i64: 4>}, {transform_indices = @transform_3, window_bounds = array<i64: 3>}, {transform_indices = @transform_4, window_bounds = array<i64: 2>}, {transform_indices = @transform_5, window_bounds = array<i64: 32, 128>}, {transform_indices = @transform_6, window_bounds = array<i64: 32, 128>}, {transform_indices = @transform_7, window_bounds = array<i64: 32, 128>}, {transform_indices = @transform_8, window_bounds = array<i64: 1, 8, 128>}]} {
    %c1_i32 = arith.constant 1 : i32
    %0 = arith.muli %arg0, %c1_i32 : i32
    %1 = arith.addi %0, %arg1 : i32
    %c4096_i32 = arith.constant 4096 : i32
    %2 = arith.muli %1, %c4096_i32 : i32
    %c4096_i32_0 = arith.constant 4096 : i32
    %3 = arith.addi %2, %c4096_i32_0 : i32
    %c0_i32 = arith.constant 0 : i32
    %4 = arith.cmpi eq, %arg1, %c0_i32 : i32
    %5 = arith.extui %4 : i1 to i32
    %c0_i32_1 = arith.constant 0 : i32
    %6 = arith.cmpi ne, %5, %c0_i32_1 : i32
    scf.if %6 {
      %cst_27 = arith.constant 0.000000e+00 : f32
      %88 = vector.broadcast %cst_27 : f32 to vector<8x128xf32>
      %c0_28 = arith.constant 0 : index
      %c0_29 = arith.constant 0 : index
      %c0_30 = arith.constant 0 : index
      %89 = vector.load %arg10[%c0_28, %c0_29, %c0_30] : memref<1x8x128xf32, #tpu.memory_space<vmem>>, vector<1x8x128xf32>
      %90 = vector.shape_cast %89 : vector<1x8x128xf32> to vector<8x128xf32>
      %91 = vector.shape_cast %88 : vector<8x128xf32> to vector<1x8x128xf32>
      tpu.vector_store %arg10[%c0_28, %c0_29, %c0_30], %91 {strides = array<i32>} : memref<1x8x128xf32, #tpu.memory_space<vmem>>, vector<1x8x128xf32>,
    } else {
    }
    %c0 = arith.constant 0 : index
    %c0_2 = arith.constant 0 : index
    %7 = vector.load %arg7[%c0, %c0_2] : memref<32x128xf32, #tpu.memory_space<vmem>>, vector<32x128xf32>
    %c0_3 = arith.constant 0 : index
    %c0_4 = arith.constant 0 : index
    %8 = vector.load %arg8[%c0_3, %c0_4] : memref<32x128xi8, #tpu.memory_space<vmem>>, vector<32x128xi8>
    %9 = arith.extsi %8 : vector<32x128xi8> to vector<32x128xi32>
    %cst = arith.constant 0.000000e+00 : f32
    %10 = vector.broadcast %cst : f32 to vector<32x128xf32>
    %cst_5 = arith.constant 0.000000e+00 : f32
    %11 = vector.broadcast %cst_5 : f32 to vector<32x128xf32>
    %c0_6 = arith.constant 0 : index
    %12 = memref.load %arg4[%c0_6] : memref<4xi32, #tpu.memory_space<smem>>
    %13 = vector.broadcast %12 : i32 to vector<32x128xi32>
    %14 = arith.cmpi eq, %9, %13 : vector<32x128xi32>
    %c0_7 = arith.constant 0 : index
    %15 = memref.load %arg2[%c0_7] : memref<4xf32, #tpu.memory_space<smem>>
    %16 = vector.broadcast %15 : f32 to vector<32x128xf32>
    %17 = arith.select %14, %16, %10 : vector<32x128xi1>, vector<32x128xf32>
    %c0_8 = arith.constant 0 : index
    %18 = memref.load %arg3[%c0_8] : memref<4xf32, #tpu.memory_space<smem>>
    %19 = vector.broadcast %18 : f32 to vector<32x128xf32>
    %20 = arith.select %14, %19, %11 : vector<32x128xi1>, vector<32x128xf32>
    %c1 = arith.constant 1 : index
    %21 = memref.load %arg4[%c1] : memref<4xi32, #tpu.memory_space<smem>>
    %22 = vector.broadcast %21 : i32 to vector<32x128xi32>
    %23 = arith.cmpi eq, %9, %22 : vector<32x128xi32>
    %c1_9 = arith.constant 1 : index
    %24 = memref.load %arg2[%c1_9] : memref<4xf32, #tpu.memory_space<smem>>
    %25 = vector.broadcast %24 : f32 to vector<32x128xf32>
    %26 = arith.select %23, %25, %17 : vector<32x128xi1>, vector<32x128xf32>
    %c1_10 = arith.constant 1 : index
    %27 = memref.load %arg3[%c1_10] : memref<4xf32, #tpu.memory_space<smem>>
    %28 = vector.broadcast %27 : f32 to vector<32x128xf32>
    %29 = arith.select %23, %28, %20 : vector<32x128xi1>, vector<32x128xf32>
    %c2 = arith.constant 2 : index
    %30 = memref.load %arg4[%c2] : memref<4xi32, #tpu.memory_space<smem>>
    %31 = vector.broadcast %30 : i32 to vector<32x128xi32>
    %32 = arith.cmpi eq, %9, %31 : vector<32x128xi32>
    %c2_11 = arith.constant 2 : index
    %33 = memref.load %arg2[%c2_11] : memref<4xf32, #tpu.memory_space<smem>>
    %34 = vector.broadcast %33 : f32 to vector<32x128xf32>
    %35 = arith.select %32, %34, %26 : vector<32x128xi1>, vector<32x128xf32>
    %c2_12 = arith.constant 2 : index
    %36 = memref.load %arg3[%c2_12] : memref<4xf32, #tpu.memory_space<smem>>
    %37 = vector.broadcast %36 : f32 to vector<32x128xf32>
    %38 = arith.select %32, %37, %29 : vector<32x128xi1>, vector<32x128xf32>
    %c3 = arith.constant 3 : index
    %39 = memref.load %arg4[%c3] : memref<4xi32, #tpu.memory_space<smem>>
    %40 = vector.broadcast %39 : i32 to vector<32x128xi32>
    %41 = arith.cmpi eq, %9, %40 : vector<32x128xi32>
    %c3_13 = arith.constant 3 : index
    %42 = memref.load %arg2[%c3_13] : memref<4xf32, #tpu.memory_space<smem>>
    %43 = vector.broadcast %42 : f32 to vector<32x128xf32>
    %44 = arith.select %41, %43, %35 : vector<32x128xi1>, vector<32x128xf32>
    %c3_14 = arith.constant 3 : index
    %45 = memref.load %arg3[%c3_14] : memref<4xf32, #tpu.memory_space<smem>>
    %46 = vector.broadcast %45 : f32 to vector<32x128xf32>
    %47 = arith.select %41, %46, %38 : vector<32x128xi1>, vector<32x128xf32>
    %48 = arith.mulf %44, %7 : vector<32x128xf32>
    %49 = arith.addf %48, %47 : vector<32x128xf32>
    %50 = tpu.iota {dimensions = array<i32: 0>} : vector<32x128xi32>
    %51 = tpu.iota {dimensions = array<i32: 1>} : vector<32x128xi32>
    %c32_i32 = arith.constant 32 : i32
    %52 = arith.muli %1, %c32_i32 : i32
    %53 = vector.broadcast %52 : i32 to vector<32x128xi32>
    %54 = arith.addi %53, %50 : vector<32x128xi32>
    %c128_i32 = arith.constant 128 : i32
    %55 = vector.broadcast %c128_i32 : i32 to vector<32x128xi32>
    %56 = arith.muli %54, %55 : vector<32x128xi32>
    %57 = arith.addi %56, %51 : vector<32x128xi32>
    %c0_i8 = arith.constant 0 : i8
    %58 = vector.broadcast %c0_i8 : i8 to vector<32x128xi8>
    %c0_15 = arith.constant 0 : index
    %c0_16 = arith.constant 0 : index
    %59 = vector.load %arg9[%c0_15, %c0_16] : memref<32x128xi8, #tpu.memory_space<vmem>>, vector<32x128xi8>
    tpu.vector_store %arg9[%c0_15, %c0_16], %58 {strides = array<i32>} : memref<32x128xi8, #tpu.memory_space<vmem>>, vector<32x128xi8>,
    %c0_17 = arith.constant 0 : index
    %60 = memref.load %arg5[%c0_17] : memref<3xi32, #tpu.memory_space<smem>>
    %c1_18 = arith.constant 1 : index
    %61 = memref.load %arg5[%c1_18] : memref<3xi32, #tpu.memory_space<smem>>
    %c0_19 = arith.constant 0 : index
    %62 = memref.load %arg6[%c0_19] : memref<2xi32, #tpu.memory_space<smem>>
    %63 = arith.addi %60, %62 : i32
    %64 = arith.cmpi slt, %60, %3 : i32
    %65 = arith.cmpi sgt, %61, %2 : i32
    %66 = arith.andi %64, %65 : i1
    %67 = arith.extui %66 : i1 to i32
    %c0_i32_20 = arith.constant 0 : i32
    %68 = arith.cmpi ne, %67, %c0_i32_20 : i32
    scf.if %68 {
      %88 = vector.broadcast %60 : i32 to vector<32x128xi32>
      %89 = arith.cmpi sge, %57, %88 : vector<32x128xi32>
      %90 = vector.broadcast %61 : i32 to vector<32x128xi32>
      %91 = arith.cmpi slt, %57, %90 : vector<32x128xi32>
      %92 = arith.andi %89, %91 : vector<32x128xi1>
      %cst_27 = arith.constant 0.000000e+00 : f32
      %93 = vector.broadcast %cst_27 : f32 to vector<32x128xf32>
      %94 = arith.select %92, %49, %93 : vector<32x128xi1>, vector<32x128xf32>
      %cst_28 = arith.constant dense<0.000000e+00> : vector<128xf32>
      %95 = vector.multi_reduction <add>, %94, %cst_28 [0] : vector<32x128xf32> to vector<128xf32>
      %96 = vector.shape_cast %95 : vector<128xf32> to vector<1x128xf32>
      %c0_29 = arith.constant 0 : index
      %c0_30 = arith.constant 0 : index
      %c0_31 = arith.constant 0 : index
      %97 = vector.load %arg10[%c0_29, %c0_30, %c0_31] : memref<1x8x128xf32, #tpu.memory_space<vmem>>, vector<1x1x128xf32>
      %98 = vector.shape_cast %97 : vector<1x1x128xf32> to vector<1x128xf32>
      %99 = arith.addf %98, %96 : vector<1x128xf32>
      %c0_32 = arith.constant 0 : index
      %c0_33 = arith.constant 0 : index
      %c0_34 = arith.constant 0 : index
      %100 = vector.load %arg10[%c0_32, %c0_33, %c0_34] : memref<1x8x128xf32, #tpu.memory_space<vmem>>, vector<1x1x128xf32>
      %101 = vector.shape_cast %100 : vector<1x1x128xf32> to vector<1x128xf32>
      %102 = vector.shape_cast %99 : vector<1x128xf32> to vector<1x1x128xf32>
      tpu.vector_store %arg10[%c0_32, %c0_33, %c0_34], %102 {strides = array<i32>} : memref<1x8x128xf32, #tpu.memory_space<vmem>>, vector<1x1x128xf32>,
    } else {
    }
    %69 = arith.cmpi slt, %60, %3 : i32
    %70 = arith.cmpi sgt, %63, %2 : i32
    %71 = arith.andi %69, %70 : i1
    %72 = arith.extui %71 : i1 to i32
    %c0_i32_21 = arith.constant 0 : i32
    %73 = arith.cmpi ne, %72, %c0_i32_21 : i32
    scf.if %73 {
      %88 = vector.broadcast %60 : i32 to vector<32x128xi32>
      %89 = arith.cmpi sge, %57, %88 : vector<32x128xi32>
      %90 = vector.broadcast %63 : i32 to vector<32x128xi32>
      %91 = arith.cmpi slt, %57, %90 : vector<32x128xi32>
      %92 = arith.andi %89, %91 : vector<32x128xi1>
      %c0_27 = arith.constant 0 : index
      %c0_28 = arith.constant 0 : index
      %93 = vector.load %arg9[%c0_27, %c0_28] : memref<32x128xi8, #tpu.memory_space<vmem>>, vector<32x128xi8>
      %c1_i8 = arith.constant 1 : i8
      %94 = vector.broadcast %c1_i8 : i8 to vector<32x128xi8>
      %95 = arith.select %92, %94, %93 : vector<32x128xi1>, vector<32x128xi8>
      %c0_29 = arith.constant 0 : index
      %c0_30 = arith.constant 0 : index
      %96 = vector.load %arg9[%c0_29, %c0_30] : memref<32x128xi8, #tpu.memory_space<vmem>>, vector<32x128xi8>
      tpu.vector_store %arg9[%c0_29, %c0_30], %95 {strides = array<i32>} : memref<32x128xi8, #tpu.memory_space<vmem>>, vector<32x128xi8>,
    } else {
    }
    %c1_22 = arith.constant 1 : index
    %74 = memref.load %arg5[%c1_22] : memref<3xi32, #tpu.memory_space<smem>>
    %c2_23 = arith.constant 2 : index
    %75 = memref.load %arg5[%c2_23] : memref<3xi32, #tpu.memory_space<smem>>
    %c1_24 = arith.constant 1 : index
    %76 = memref.load %arg6[%c1_24] : memref<2xi32, #tpu.memory_space<smem>>
    %77 = arith.addi %74, %76 : i32
    %78 = arith.cmpi slt, %74, %3 : i32
    %79 = arith.cmpi sgt, %75, %2 : i32
    %80 = arith.andi %78, %79 : i1
    %81 = arith.extui %80 : i1 to i32
    %c0_i32_25 = arith.constant 0 : i32
    %82 = arith.cmpi ne, %81, %c0_i32_25 : i32
    scf.if %82 {
      %88 = vector.broadcast %74 : i32 to vector<32x128xi32>
      %89 = arith.cmpi sge, %57, %88 : vector<32x128xi32>
      %90 = vector.broadcast %75 : i32 to vector<32x128xi32>
      %91 = arith.cmpi slt, %57, %90 : vector<32x128xi32>
      %92 = arith.andi %89, %91 : vector<32x128xi1>
      %cst_27 = arith.constant 0.000000e+00 : f32
      %93 = vector.broadcast %cst_27 : f32 to vector<32x128xf32>
      %94 = arith.select %92, %49, %93 : vector<32x128xi1>, vector<32x128xf32>
      %cst_28 = arith.constant dense<0.000000e+00> : vector<128xf32>
      %95 = vector.multi_reduction <add>, %94, %cst_28 [0] : vector<32x128xf32> to vector<128xf32>
      %96 = vector.shape_cast %95 : vector<128xf32> to vector<1x128xf32>
      %c0_29 = arith.constant 0 : index
      %c1_30 = arith.constant 1 : index
      %c0_31 = arith.constant 0 : index
      %97 = vector.load %arg10[%c0_29, %c1_30, %c0_31] : memref<1x8x128xf32, #tpu.memory_space<vmem>>, vector<1x1x128xf32>
      %98 = vector.shape_cast %97 : vector<1x1x128xf32> to vector<1x128xf32>
      %99 = arith.addf %98, %96 : vector<1x128xf32>
      %c0_32 = arith.constant 0 : index
      %c1_33 = arith.constant 1 : index
      %c0_34 = arith.constant 0 : index
      %100 = vector.load %arg10[%c0_32, %c1_33, %c0_34] : memref<1x8x128xf32, #tpu.memory_space<vmem>>, vector<1x1x128xf32>
      %101 = vector.shape_cast %100 : vector<1x1x128xf32> to vector<1x128xf32>
      %102 = vector.shape_cast %99 : vector<1x128xf32> to vector<1x1x128xf32>
      tpu.vector_store %arg10[%c0_32, %c1_33, %c0_34], %102 {strides = array<i32>} : memref<1x8x128xf32, #tpu.memory_space<vmem>>, vector<1x1x128xf32>,
    } else {
    }
    %83 = arith.cmpi slt, %74, %3 : i32
    %84 = arith.cmpi sgt, %77, %2 : i32
    %85 = arith.andi %83, %84 : i1
    %86 = arith.extui %85 : i1 to i32
    %c0_i32_26 = arith.constant 0 : i32
    %87 = arith.cmpi ne, %86, %c0_i32_26 : i32
    scf.if %87 {
      %88 = vector.broadcast %74 : i32 to vector<32x128xi32>
      %89 = arith.cmpi sge, %57, %88 : vector<32x128xi32>
      %90 = vector.broadcast %77 : i32 to vector<32x128xi32>
      %91 = arith.cmpi slt, %57, %90 : vector<32x128xi32>
      %92 = arith.andi %89, %91 : vector<32x128xi1>
      %c0_27 = arith.constant 0 : index
      %c0_28 = arith.constant 0 : index
      %93 = vector.load %arg9[%c0_27, %c0_28] : memref<32x128xi8, #tpu.memory_space<vmem>>, vector<32x128xi8>
      %c1_i8 = arith.constant 1 : i8
      %94 = vector.broadcast %c1_i8 : i8 to vector<32x128xi8>
      %95 = arith.select %92, %94, %93 : vector<32x128xi1>, vector<32x128xi8>
      %c0_29 = arith.constant 0 : index
      %c0_30 = arith.constant 0 : index
      %96 = vector.load %arg9[%c0_29, %c0_30] : memref<32x128xi8, #tpu.memory_space<vmem>>, vector<32x128xi8>
      tpu.vector_store %arg9[%c0_29, %c0_30], %95 {strides = array<i32>} : memref<32x128xi8, #tpu.memory_space<vmem>>, vector<32x128xi8>,
    } else {
    }
    return
  }
  func.func @transform_0(%arg0: i32, %arg1: i32) -> i32 {
    %c0_i32 = arith.constant 0 : i32
    %c0_i32_0 = arith.constant 0 : i32
    return %c0_i32 : i32
  }
  func.func @transform_1(%arg0: i32, %arg1: i32) -> i32 {
    %c0_i32 = arith.constant 0 : i32
    %c0_i32_0 = arith.constant 0 : i32
    return %c0_i32 : i32
  }
  func.func @transform_2(%arg0: i32, %arg1: i32) -> i32 {
    %c0_i32 = arith.constant 0 : i32
    %c0_i32_0 = arith.constant 0 : i32
    return %c0_i32 : i32
  }
  func.func @transform_3(%arg0: i32, %arg1: i32) -> i32 {
    %c0_i32 = arith.constant 0 : i32
    %c0_i32_0 = arith.constant 0 : i32
    return %c0_i32 : i32
  }
  func.func @transform_4(%arg0: i32, %arg1: i32) -> i32 {
    %c0_i32 = arith.constant 0 : i32
    %c0_i32_0 = arith.constant 0 : i32
    return %c0_i32 : i32
  }
  func.func @transform_5(%arg0: i32, %arg1: i32) -> (i32, i32) {
    %c1_i32 = arith.constant 1 : i32
    %0 = arith.muli %arg0, %c1_i32 : i32
    %1 = arith.addi %0, %arg1 : i32
    %c0_i32 = arith.constant 0 : i32
    %c0_i32_0 = arith.constant 0 : i32
    return %1, %c0_i32 : i32, i32
  }
  func.func @transform_6(%arg0: i32, %arg1: i32) -> (i32, i32) {
    %c1_i32 = arith.constant 1 : i32
    %0 = arith.muli %arg0, %c1_i32 : i32
    %1 = arith.addi %0, %arg1 : i32
    %c0_i32 = arith.constant 0 : i32
    %c0_i32_0 = arith.constant 0 : i32
    return %1, %c0_i32 : i32, i32
  }
  func.func @transform_7(%arg0: i32, %arg1: i32) -> (i32, i32) {
    %c1_i32 = arith.constant 1 : i32
    %0 = arith.muli %arg0, %c1_i32 : i32
    %1 = arith.addi %0, %arg1 : i32
    %c0_i32 = arith.constant 0 : i32
    %c0_i32_0 = arith.constant 0 : i32
    return %1, %c0_i32 : i32, i32
  }
  func.func @transform_8(%arg0: i32, %arg1: i32) -> (i32, i32, i32) {
    %c0_i32 = arith.constant 0 : i32
    %c0_i32_0 = arith.constant 0 : i32
    %c0_i32_1 = arith.constant 0 : i32
    return %arg0, %c0_i32, %c0_i32_0 : i32, i32, i32
  }
}

</mosaic_0001>

<bundles_post_ra>
// kernel: tpu_custom_call.1
= control target key start
LH: loop header
LB: loop body
LE: loop exit
PB: predicated region body
PF: predicated region fallthrough
CT: control target
= control target key end

     0   :  { %14 = vsyncpa [#allocation5], 0  ;;  %s883_s0 = inlined_call_operand.hbm [shape: f32[4], index: 0, kind: input, shape index: {}]   ;;  %s884_s1 = inlined_call_operand.vmem [shape: f32[4], index: 1, kind: input, shape index: {}]   ;;  %s885_s2 = inlined_call_operand.vmem [shape: s32[4], index: 2, kind: input, shape index: {}]   ;;  %s886_s3 = inlined_call_operand.vmem [shape: s32[3], index: 3, kind: input, shape index: {}]   ;;  %s887_s4 = inlined_call_operand.vmem [shape: s32[2], index: 4, kind: input, shape index: {}]   ;;  %s888_s5 = inlined_call_operand.hbm [shape: f32[32,128], index: 5, kind: input, shape index: {}]   ;;  %s889_s6 = inlined_call_operand.vmem [shape: s8[32,128], index: 6, kind: input, shape index: {}]   ;;  %s890_s7 = inlined_call_operand.hbm [shape: s8[32,128], index: 7, kind: output, shape index: {0}]   ;;  %s891_s8 = inlined_call_operand.hbm [shape: f32[1,8,128], index: 8, kind: output, shape index: {1}]  }
   0x1   :  { %15 = vsyncpa [#allocation6], 0 }
   0x2   :  { %16 = vsyncpa [#allocation9], 0 }
   0x3   :  { %17 = vsyncpa [#allocation12], 0 }
   0x4   :  { %18 = vsyncpa [#allocation3], 0 }
   0x5   :  { %19 = vsyncpa [#allocation4], 0  ;;  %s45_s29 = sshll.u32 %s885_s2, 4  ;;  %s46_s29 = int_to_ptr.vmem [resolvable:$true] %s45_s29 }
   0x6   :  { %20 = vsyncpa [#allocation16], 0  ;;  %s444_s30 = scalar_lea.vmem %s46_s29, 16  ;;  %p449_p1 = scmp.lt.s32.totalorder %s46_s29, %s46_s29 }
   0x7   :  { %p445_p0 = scmp.ne.s32.totalorder %s46_s29, %s444_s30  ;;  %p450_p2 = scmp.lt.s32.totalorder %s444_s30, %s444_s30 }
   0x9   :  { %p451_p3 = por %p450_p2, %p449_p1 }
   0xb   :  { %p452_p4 = pnand %p451_p3, %p445_p0 }
   0xd   :  { %455 = shalt.err (!%p452_p4)
}
   0xe   :  { %s582_s9 = smov [#allocation8]   ;;  %s456_s12 = scalar_lea.hbm %s883_s0, 16 }
   0xf   :  { %48 = dma.vmem_to_smem %s46_s29, 16, %s582_s9, [#allocation9]  }
  0x10   :  { %p457_p5 = scmp.ne.s32.totalorder %s883_s0, %s456_s12  ;;  %p460_p6 = scmp.lt.u32.totalorder %s456_s12, %s883_s0 }
  0x12   :  { %p462_p7 = pnand %p460_p6, %p457_p5 }
  0x14   :  { %465 = shalt.err (!%p462_p7)
}
  0x15   :  { %s583_s16 = smov [#allocation2]   ;;  %s35_s21 = sshll.u32 %s884_s1, 4  ;;  %s36_s21 = int_to_ptr.vmem [resolvable:$true] %s35_s21 }
  0x16   :  { %28 = dma.hbm_to_smem %s883_s0, 16, %s583_s16, [#allocation5]  }
  0x17   :  { %s55_s24 = sshll.u32 %s886_s3, 4  ;;  %s466_s25 = scalar_lea.vmem %s36_s21, 16  ;;  %s56_s24 = int_to_ptr.vmem [resolvable:$true] %s55_s24 }
  0x18   :  { %p467_p8 = scmp.ne.s32.totalorder %s36_s21, %s466_s25  ;;  %p471_p9 = scmp.lt.s32.totalorder %s36_s21, %s36_s21 }
  0x19   :  { %p472_p10 = scmp.lt.s32.totalorder %s466_s25, %s466_s25 }
  0x1b   :  { %p473_p11 = por %p472_p10, %p471_p9 }
  0x1d   :  { %p474_p12 = pnand %p473_p11, %p467_p8 }
  0x1f   :  { %477 = shalt.err (!%p474_p12)
}
  0x20   :  { %s584_s26 = smov [#allocation7]   ;;  %s478_s0 = scalar_lea.vmem %s56_s24, 16 }
  0x21   :  { %38 = dma.vmem_to_smem %s36_s21, 16, %s584_s26, [#allocation6]  }
  0x22   :  { %p479_p13 = scmp.ne.s32.totalorder %s56_s24, %s478_s0  ;;  %p483_p0 = scmp.lt.s32.totalorder %s56_s24, %s56_s24 }
  0x23   :  { %p484_p1 = scmp.lt.s32.totalorder %s478_s0, %s478_s0 }
  0x25   :  { %p485_p2 = por %p484_p1, %p483_p0 }
  0x27   :  { %p486_p3 = pnand %p485_p2, %p479_p13 }
  0x29   :  { %489 = shalt.err (!%p486_p3)
}
  0x2a   :  { %s585_s1 = smov [#allocation10]   ;;  %s65_s28 = sshll.u32 %s887_s4, 4  ;;  %s66_s28 = int_to_ptr.vmem [resolvable:$true] %s65_s28 }
  0x2b   :  { %58 = dma.vmem_to_smem %s56_s24, 16, %s585_s1, [#allocation9]  }
  0x2c   :  { %s490_s29 = scalar_lea.vmem %s66_s28, 16  ;;  %p495_p5 = scmp.lt.s32.totalorder %s66_s28, %s66_s28 }
  0x2d   :  { %p491_p4 = scmp.ne.s32.totalorder %s66_s28, %s490_s29  ;;  %p496_p6 = scmp.lt.s32.totalorder %s490_s29, %s490_s29 }
  0x2f   :  { %p497_p7 = por %p496_p6, %p495_p5 }
  0x31   :  { %p498_p8 = pnand %p497_p7, %p491_p4 }
  0x33   :  { %501 = shalt.err (!%p498_p8)
}
  0x34   :  { %s586_s30 = smov [#allocation11]   ;;  %s587_s9 = smov [#allocation13]  }
  0x35   :  { %68 = dma.vmem_to_smem %s66_s28, 16, %s586_s30, [#allocation12]  }
  0x36   :  { %s78_s10 = sshll.u32 %s587_s9, 4  ;;  %s502_s13 = scalar_lea.hbm %s888_s5, 512  ;;  %s79_s10 = int_to_ptr.vmem [resolvable:$true] %s78_s10 }
  0x37   :  { %p503_p9 = scmp.ne.s32.totalorder %s888_s5, %s502_s13  ;;  %p506_p10 = scmp.lt.u32.totalorder %s502_s13, %s888_s5 }
  0x39   :  { %p508_p11 = pnand %p506_p10, %p503_p9 }
  0x3b   :  { %511 = shalt.err (!%p508_p11)
}
  0x3c   :  { %s512_s16 = scalar_lea.vmem %s79_s10, 512  ;;  %p517_p13 = scmp.lt.s32.totalorder %s79_s10, %s79_s10 }
  0x3d   :  { %p513_p12 = scmp.ne.s32.totalorder %s79_s10, %s512_s16  ;;  %p518_p0 = scmp.lt.s32.totalorder %s512_s16, %s512_s16 }
  0x3f   :  { %p519_p1 = por %p518_p0, %p517_p13 }
  0x41   :  { %p520_p2 = pnand %p519_p1, %p513_p12 }
  0x43   :  { %523 = shalt.err (!%p520_p2)
}
  0x44   :  { %s588_s17 = smov 128   ;;  %s589_s18 = smov 8  }
  0x45   :  { %84 = dma.hbm_to_vmem [thread:$0]  %s888_s5, 512, %s79_s10, [#allocation3], %s588_s17, %s588_s17, %s589_s18  }
  0x46   :  { %568 = dma.done.wait [#allocation5], 16  }
  0x47   :  { %569 = vsyncadd [#allocation5], 4294967280 }
  0x48   :  { %570 = dma.done.wait [#allocation6], 16  }
  0x49   :  { %571 = vsyncadd [#allocation6], 4294967280 }
  0x4a   :  { %572 = dma.done.wait [#allocation9], 32  }
  0x4b   :  { %573 = vsyncadd [#allocation9], 4294967264 }
  0x4c   :  { %574 = dma.done.wait [#allocation12], 16  }
  0x4d   :  { %575 = vsyncadd [#allocation12], 4294967280 }
  0x4e   :  { %576 = dma.done.wait [#allocation3], 512  }
  0x4f   :  { %577 = vsyncadd [#allocation3], 4294966784 }
  0x50   :  { %111 = sfence }
  0x51   :  { %s145_s21 = sld [smem:[#allocation8]]  ;;  %v225_v0 = vlaneseq  ;;  %v590_v1 = vmov 0.0   ;;  %v140_v2 = vld [vmem:[%s889_s6] sm:$0xff]  ;;  %s419_s25 = sld [smem:[#allocation8 + $0x1]]  ;;  %v591_v10 = vmov 0   ;;  %v136_v47 = vld [vmem:[#allocation13] sm:$0xff] }
  0x52   :  { %135 = vst [vmem:[#allocation15] sm:$0xff] %v590_v1  ;;  %s151_s5 = sld [smem:[#allocation2]]  ;;  %v678_v3 = vunpack.c.0.s8 %v140_v2  ;;  %s420_s26 = sld [smem:[#allocation2 + $0x1]]  ;;  %v680_v4 = vunpack.c.1.s8 %v140_v2  ;;  %v682_v5 = vunpack.c.2.s8 %v140_v2  ;;  %v684_v6 = vunpack.c.3.s8 %v140_v2  ;;  %246 = vst [vmem:[#allocation14] sm:$0xff] %v591_v10  ;;  %v137_v52 = vld [vmem:[#allocation13 + $0x8] sm:$0xff]  ;;  %v138_v53 = vld [vmem:[#allocation13 + $0x10] sm:$0xff] }
  0x53   :  { %s157_s24 = sld [smem:[#allocation7]]  ;;  %v686_v7 = vshrl.u32 %v225_v0, 7  ;;  %s688_s0 = sld [smem:[#allocation7 + $0x1]]  ;;  %v699_v9 = vand.u32 127, %v225_v0  ;;  %v139_v54 = vld [vmem:[#allocation13 + $0x18] sm:$0xff] }
  0x54   :  { %s690_s1 = sld [smem:[#allocation8 + $0x2]]  ;;  %s708_s27 = sld [smem:[#allocation10]] }
  0x55   :  { %s692_s3 = sld [smem:[#allocation2 + $0x2]]  ;;  %v697_v8 = vadd.s32 8, %v686_v7  ;;  %v702_v12 = vadd.s32 16, %v686_v7  ;;  %v705_v13 = vadd.s32 24, %v686_v7  ;;  %v238_v14 = vmul.u32 128, %v686_v7  ;;  %s714_s28 = sld [smem:[#allocation10 + $0x1]] }
  0x56   :  { %s694_s6 = sld [smem:[#allocation7 + $0x2]]  ;;  %s716_s29 = sld [smem:[#allocation11]] }
  0x57   :  { %v146_v11 = vstv %s145_s21  ;;  %v164_v17 = vstv %s419_s25  ;;  %s718_s30 = sld [smem:[#allocation8 + $0x3]]  ;;  %v239_v51 = vmul.u32 128, %v697_v8 }
  0x58   :  { %vm147_vm0 = vcmp.eq.s32.totalorder %v678_v3, %v146_v11  ;;  %vm148_vm1 = vcmp.eq.s32.totalorder %v680_v4, %v146_v11  ;;  %vm149_vm2 = vcmp.eq.s32.totalorder %v682_v5, %v146_v11  ;;  %vm150_vm3 = vcmp.eq.s32.totalorder %v684_v6, %v146_v11  ;;  %s728_s9 = sld [smem:[#allocation2 + $0x3]] }
  0x59   :  { %v152_v15 = vstv %s151_s5  ;;  %v158_v16 = vstv %s157_s24  ;;  %v170_v18 = vstv %s420_s26  ;;  %s738_s10 = sld [smem:[#allocation7 + $0x3]]  ;;  %vm165_vm4 = vcmp.eq.s32.totalorder %v678_v3, %v164_v17 }
  0x5a   :  { %v153_v19 = vsel %vm147_vm0, %v152_v15, 0.0  ;;  %v154_v20 = vsel %vm148_vm1, %v152_v15, 0.0  ;;  %v155_v21 = vsel %vm149_vm2, %v152_v15, 0.0  ;;  %v156_v22 = vsel %vm150_vm3, %v152_v15, 0.0  ;;  %p251_p3 = scmp.lt.s32.totalorder %s708_s27, 4096 }
  0x5b   :  { %v159_v23 = vsel %vm147_vm0, %v158_v16, 0.0  ;;  %v160_v24 = vsel %vm148_vm1, %v158_v16, 0.0  ;;  %v161_v25 = vsel %vm149_vm2, %v158_v16, 0.0  ;;  %v162_v26 = vsel %vm150_vm3, %v158_v16, 0.0  ;;  %p252_p4 = scmp.gt.s32.totalorder %s714_s28, 0 }
  0x5c   :  { %vm166_vm5 = vcmp.eq.s32.totalorder %v680_v4, %v164_v17  ;;  %vm167_vm6 = vcmp.eq.s32.totalorder %v682_v5, %v164_v17  ;;  %vm168_vm7 = vcmp.eq.s32.totalorder %v684_v6, %v164_v17  ;;  %v171_v27 = vsel %vm165_vm4, %v170_v18, %v153_v19  ;;  %s751_s11 = sadd.s32 %s716_s29, %s708_s27 }
  0x5d   :  { %v172_v28 = vsel %vm166_vm5, %v170_v18, %v154_v20  ;;  %v173_v29 = vsel %vm167_vm6, %v170_v18, %v155_v21  ;;  %v174_v30 = vsel %vm168_vm7, %v170_v18, %v156_v22  ;;  %v176_v31 = vstv %s688_s0  ;;  %p760_p5 = pnand %p252_p4, %p251_p3 }
  0x5e   :  { %v182_v32 = vstv %s690_s1  ;;  %v188_v33 = vstv %s692_s3  ;;  %v194_v34 = vstv %s694_s6  ;;  %v177_v35 = vsel %vm165_vm4, %v176_v31, %v159_v23 }
  0x5f   :  { %v178_v36 = vsel %vm166_vm5, %v176_v31, %v160_v24  ;;  %v179_v37 = vsel %vm167_vm6, %v176_v31, %v161_v25  ;;  %v180_v38 = vsel %vm168_vm7, %v176_v31, %v162_v26  ;;  %vm183_vm8 = vcmp.eq.s32.totalorder %v678_v3, %v182_v32 }
  0x60   :  { %vm184_vm9 = vcmp.eq.s32.totalorder %v680_v4, %v182_v32  ;;  %vm185_vm10 = vcmp.eq.s32.totalorder %v682_v5, %v182_v32  ;;  %vm186_vm11 = vcmp.eq.s32.totalorder %v684_v6, %v182_v32  ;;  %v189_v39 = vsel %vm183_vm8, %v188_v33, %v171_v27  ;;  %v284_v27 = vld [vmem:[#allocation15] sm:$0x1] (!%p760_p5) }
  0x61   :  { %v190_v40 = vsel %vm184_vm9, %v188_v33, %v172_v28  ;;  %v191_v41 = vsel %vm185_vm10, %v188_v33, %v173_v29  ;;  %v192_v42 = vsel %vm186_vm11, %v188_v33, %v174_v30  ;;  %v195_v43 = vsel %vm183_vm8, %v194_v34, %v177_v35 }
  0x62   :  { %v196_v44 = vsel %vm184_vm9, %v194_v34, %v178_v36  ;;  %v197_v45 = vsel %vm185_vm10, %v194_v34, %v179_v37  ;;  %v198_v46 = vsel %vm186_vm11, %v194_v34, %v180_v38  ;;  %v200_v48 = vstv %s718_s30 }
  0x63   :  { %v206_v49 = vstv %s728_s9  ;;  %v212_v50 = vstv %s738_s10  ;;  %vm201_vm12 = vcmp.eq.s32.totalorder %v678_v3, %v200_v48  ;;  %vm202_vm13 = vcmp.eq.s32.totalorder %v680_v4, %v200_v48  ;;  %256 = sbr.rel (%p760_p5) target bundleno = 132 (0x84), region = 61 }
  0x64   :  { %vm203_vm14 = vcmp.eq.s32.totalorder %v682_v5, %v200_v48  ;;  %vm204_vm15 = vcmp.eq.s32.totalorder %v684_v6, %v200_v48  ;;  %v207_v55 = vsel %vm201_vm12, %v206_v49, %v189_v39  ;;  %v208_v56 = vsel %vm202_vm13, %v206_v49, %v190_v40 }
  0x65   :  { %v209_v57 = vsel %vm203_vm14, %v206_v49, %v191_v41  ;;  %v210_v58 = vsel %vm204_vm15, %v206_v49, %v192_v42  ;;  %v213_v59 = vsel %vm201_vm12, %v212_v50, %v195_v43  ;;  %v214_v60 = vsel %vm202_vm13, %v212_v50, %v196_v44 }
  0x66   :  { %v215_v61 = vsel %vm203_vm14, %v212_v50, %v197_v45  ;;  %v216_v62 = vsel %vm204_vm15, %v212_v50, %v198_v46  ;;  %v217_v63 = vmul.f32 %v207_v55, %v136_v47  ;;  %v218_v0 = vmul.f32 %v208_v56, %v137_v52 }
  0x67   :  { %v219_v1 = vmul.f32 %v209_v57, %v138_v53  ;;  %v220_v2 = vmul.f32 %v210_v58, %v139_v54  ;;  %v240_v3 = vmul.u32 128, %v702_v12  ;;  %v241_v4 = vmul.u32 128, %v705_v13 }
  0x68   :  { %v777_v5 = vadd.s32 %v238_v14, %v699_v9  ;;  %v780_v6 = vadd.s32 %v239_v51, %v699_v9  ;;  %v782_v8 = vadd.f32 %v217_v63, %v213_v59  ;;  %v784_v10 = vadd.f32 %v218_v0, %v214_v60 }
  0x69   :  { %v786_v11 = vadd.f32 %v219_v1, %v215_v61  ;;  %v788_v15 = vadd.f32 %v220_v2, %v216_v62  ;;  %v791_v12 = vadd.s32 %v240_v3, %v699_v9  ;;  %v794_v13 = vadd.s32 %v241_v4, %v699_v9 }
  0x6a   :  { %v257_v7 = vstv %s708_s27  ;;  %v262_v14 = vstv %s714_s28 }
  0x6b   :  { %vm258_vm0 = vcmp.ge.s32.totalorder %v777_v5, %v257_v7  ;;  %vm259_vm1 = vcmp.ge.s32.totalorder %v780_v6, %v257_v7  ;;  %vm260_vm2 = vcmp.ge.s32.totalorder %v791_v12, %v257_v7  ;;  %vm263_vm3 = vcmp.lt.s32.totalorder %v777_v5, %v262_v14 }
  0x6c   :  { %vm264_vm4 = vcmp.lt.s32.totalorder %v780_v6, %v262_v14  ;;  %vm265_vm5 = vcmp.lt.s32.totalorder %v791_v12, %v262_v14  ;;  %vm261_vm6 = vcmp.ge.s32.totalorder %v794_v13, %v257_v7  ;;  %vm266_vm7 = vcmp.lt.s32.totalorder %v794_v13, %v262_v14  ;;  %vm267_vm8 = vmand %vm258_vm0, %vm263_vm3 }
  0x6d   :  { %vm268_vm9 = vmand %vm259_vm1, %vm264_vm4  ;;  %v271_v9 = vsel %vm267_vm8, %v782_v8, 0.0 }
  0x6e   :  { %vm269_vm10 = vmand %vm260_vm2, %vm265_vm5  ;;  %v272_v16 = vsel %vm268_vm9, %v784_v10, 0.0 }
  0x6f   :  { %vm270_vm11 = vmand %vm261_vm6, %vm266_vm7  ;;  %v273_v17 = vsel %vm269_vm10, %v786_v11, 0.0  ;;  %v275_v18 = vadd.f32 %v272_v16, %v271_v9 }
  0x70   :  { %v274_v19 = vsel %vm270_vm11, %v788_v15, 0.0 }
  0x71   :  { %v276_v20 = vadd.f32 %v275_v18, %v273_v17 }
  0x73   :  { %v277_v21 = vadd.f32 %v276_v20, %v274_v19 }
  0x75   :  { %v278_v22 = vrot.slane %v277_v21, 4 }
  0x77   :  { %v279_v23 = vadd.f32 %v278_v22, %v277_v21 }
  0x79   :  { %v280_v24 = vrot.slane %v279_v23, 2 }
  0x7b   :  { %v281_v25 = vadd.f32 %v280_v24, %v279_v23 }
  0x7d   :  { %v282_v26 = vrot.slane %v281_v25, 1 }
  0x7f   :  { %v283_v28 = vadd.f32 %v282_v26, %v281_v25 }
  0x81   :  { %v285_v29 = vadd.f32 %v284_v27, %v283_v28 }
  0x83   :  { %286 = vst [vmem:[#allocation15] sm:$0x1] %v285_v29 }
  0x84 PF:  { %p287_p6 = scmp.gt.s32.totalorder %s751_s11, 0 }
  0x86   :  { %p288_p7 = pnand %p287_p6, %p251_p3 }
  0x87   :  { %v292_v30 = vstv (!%p288_p7), %s708_s27  ;;  %v297_v31 = vstv (!%p288_p7), %s751_s11  ;;  %v306_v32 = vld [vmem:[#allocation14] sm:$0xff] (!%p288_p7) }
  0x88   :  { %291 = sbr.rel (%p288_p7) target bundleno = 146 (0x92), region = 65  ;;  %vm293_vm12 = vcmp.ge.s32.totalorder (!%p288_p7), %v777_v5, %v292_v30  ;;  %vm294_vm13 = vcmp.ge.s32.totalorder (!%p288_p7), %v780_v6, %v292_v30  ;;  %vm295_vm14 = vcmp.ge.s32.totalorder (!%p288_p7), %v791_v12, %v292_v30  ;;  %vm298_vm15 = vcmp.lt.s32.totalorder (!%p288_p7), %v777_v5, %v297_v31 }
  0x89   :  { %vm299_vm0 = vcmp.lt.s32.totalorder (!%p288_p7), %v780_v6, %v297_v31  ;;  %vm300_vm1 = vcmp.lt.s32.totalorder (!%p288_p7), %v791_v12, %v297_v31  ;;  %vm296_vm2 = vcmp.ge.s32.totalorder (!%p288_p7), %v794_v13, %v292_v30  ;;  %vm301_vm3 = vcmp.lt.s32.totalorder (!%p288_p7), %v794_v13, %v297_v31  ;;  %vm302_vm4 = vmand (!%p288_p7), %vm293_vm12, %vm298_vm15 }
  0x8a   :  { %vm303_vm5 = vmand (!%p288_p7), %vm294_vm13, %vm299_vm0 }
  0x8b   :  { %vm304_vm6 = vmand (!%p288_p7), %vm295_vm14, %vm300_vm1 }
  0x8c   :  { %vm305_vm7 = vmand (!%p288_p7), %vm296_vm2, %vm301_vm3 }
  0x8d   :  { %vm307_vm8 = vmpackc.low (!%p288_p7), %vm303_vm5, %vm302_vm4 }
  0x8e   :  { %vm308_vm9 = vmpackc.low (!%p288_p7), %vm305_vm7, %vm304_vm6 }
  0x8f   :  { %vm309_vm10 = vmpackc.even %vm308_vm9, %vm307_vm8 }
  0x90   :  { %v310_v33 = vsel %vm309_vm10, 16843009, %v306_v32 }
  0x91   :  { %311 = vst [vmem:[#allocation14] sm:$0xff] %v310_v33 }
  0x92 PF:  { %s825_s13 = sld [smem:[#allocation10 + $0x1]]  ;;  %s430_s14 = sld [smem:[#allocation10 + $0x2]] }
  0x93   :  { %s431_s2 = sld [smem:[#allocation11 + $0x1]] }
  0x98   :  { %p316_p8 = scmp.lt.s32.totalorder %s825_s13, 4096  ;;  %p317_p9 = scmp.gt.s32.totalorder %s430_s14, 0 }
  0x99   :  { %s829_s4 = sadd.s32 %s431_s2, %s825_s13 }
  0x9a   :  { %p318_p10 = pnand %p317_p9, %p316_p8 }
  0x9b   :  { %v322_v34 = vstv (!%p318_p10), %s825_s13  ;;  %v327_v35 = vstv (!%p318_p10), %s430_s14  ;;  %v349_v48 = vld [vmem:[#allocation15 + $0x1] sm:$0x1] (!%p318_p10) }
  0x9c   :  { %321 = sbr.rel (%p318_p10) target bundleno = 181 (0xb5), region = 69  ;;  %vm323_vm11 = vcmp.ge.s32.totalorder (!%p318_p10), %v777_v5, %v322_v34  ;;  %vm324_vm12 = vcmp.ge.s32.totalorder (!%p318_p10), %v780_v6, %v322_v34  ;;  %vm325_vm13 = vcmp.ge.s32.totalorder (!%p318_p10), %v791_v12, %v322_v34  ;;  %vm328_vm14 = vcmp.lt.s32.totalorder (!%p318_p10), %v777_v5, %v327_v35 }
  0x9d   :  { %vm329_vm15 = vcmp.lt.s32.totalorder (!%p318_p10), %v780_v6, %v327_v35  ;;  %vm330_vm0 = vcmp.lt.s32.totalorder (!%p318_p10), %v791_v12, %v327_v35  ;;  %vm326_vm1 = vcmp.ge.s32.totalorder (!%p318_p10), %v794_v13, %v322_v34  ;;  %vm331_vm2 = vcmp.lt.s32.totalorder (!%p318_p10), %v794_v13, %v327_v35  ;;  %vm332_vm3 = vmand (!%p318_p10), %vm323_vm11, %vm328_vm14 }
  0x9e   :  { %vm333_vm4 = vmand (!%p318_p10), %vm324_vm12, %vm329_vm15  ;;  %v336_v36 = vsel (!%p318_p10), %vm332_vm3, %v782_v8, 0.0 }
  0x9f   :  { %vm334_vm5 = vmand (!%p318_p10), %vm325_vm13, %vm330_vm0  ;;  %v337_v37 = vsel (!%p318_p10), %vm333_vm4, %v784_v10, 0.0 }
  0xa0   :  { %vm335_vm6 = vmand (!%p318_p10), %vm326_vm1, %vm331_vm2  ;;  %v338_v38 = vsel (!%p318_p10), %vm334_vm5, %v786_v11, 0.0  ;;  %v340_v39 = vadd.f32 (!%p318_p10), %v337_v37, %v336_v36 }
  0xa1   :  { %v339_v40 = vsel (!%p318_p10), %vm335_vm6, %v788_v15, 0.0 }
  0xa2   :  { %v341_v41 = vadd.f32 (!%p318_p10), %v340_v39, %v338_v38 }
  0xa4   :  { %v342_v42 = vadd.f32 %v341_v41, %v339_v40 }
  0xa6   :  { %v343_v43 = vrot.slane %v342_v42, 4 }
  0xa8   :  { %v344_v44 = vadd.f32 %v343_v43, %v342_v42 }
  0xaa   :  { %v345_v45 = vrot.slane %v344_v44, 2 }
  0xac   :  { %v346_v46 = vadd.f32 %v345_v45, %v344_v44 }
  0xae   :  { %v347_v47 = vrot.slane %v346_v46, 1 }
  0xb0   :  { %v348_v49 = vadd.f32 %v347_v47, %v346_v46 }
  0xb2   :  { %v350_v50 = vadd.f32 %v349_v48, %v348_v49 }
  0xb4   :  { %351 = vst [vmem:[#allocation15 + $0x1] sm:$0x1] %v350_v50 }
  0xb5 PF:  { %p352_p11 = scmp.gt.s32.totalorder %s829_s4, 0 }
  0xb7   :  { %p353_p12 = pnand %p352_p11, %p316_p8 }
  0xb8   :  { %v357_v51 = vstv (!%p353_p12), %s825_s13  ;;  %v362_v52 = vstv (!%p353_p12), %s829_s4  ;;  %v371_v53 = vld [vmem:[#allocation14] sm:$0xff] (!%p353_p12) }
  0xb9   :  { %356 = sbr.rel (%p353_p12) target bundleno = 195 (0xc3), region = 73  ;;  %vm358_vm7 = vcmp.ge.s32.totalorder (!%p353_p12), %v777_v5, %v357_v51  ;;  %vm359_vm8 = vcmp.ge.s32.totalorder (!%p353_p12), %v780_v6, %v357_v51  ;;  %vm360_vm9 = vcmp.ge.s32.totalorder (!%p353_p12), %v791_v12, %v357_v51  ;;  %vm363_vm10 = vcmp.lt.s32.totalorder (!%p353_p12), %v777_v5, %v362_v52 }
  0xba   :  { %vm364_vm11 = vcmp.lt.s32.totalorder (!%p353_p12), %v780_v6, %v362_v52  ;;  %vm365_vm12 = vcmp.lt.s32.totalorder (!%p353_p12), %v791_v12, %v362_v52  ;;  %vm361_vm13 = vcmp.ge.s32.totalorder (!%p353_p12), %v794_v13, %v357_v51  ;;  %vm366_vm14 = vcmp.lt.s32.totalorder (!%p353_p12), %v794_v13, %v362_v52  ;;  %vm367_vm15 = vmand (!%p353_p12), %vm358_vm7, %vm363_vm10 }
  0xbb   :  { %vm368_vm0 = vmand (!%p353_p12), %vm359_vm8, %vm364_vm11 }
  0xbc   :  { %vm369_vm1 = vmand (!%p353_p12), %vm360_vm9, %vm365_vm12 }
  0xbd   :  { %vm370_vm2 = vmand (!%p353_p12), %vm361_vm13, %vm366_vm14 }
  0xbe   :  { %vm372_vm3 = vmpackc.low (!%p353_p12), %vm368_vm0, %vm367_vm15 }
  0xbf   :  { %vm373_vm4 = vmpackc.low (!%p353_p12), %vm370_vm2, %vm369_vm1 }
  0xc0   :  { %vm374_vm5 = vmpackc.even %vm373_vm4, %vm372_vm3 }
  0xc1   :  { %v375_v54 = vsel %vm374_vm5, 16843009, %v371_v53 }
  0xc2   :  { %376 = vst [vmem:[#allocation14] sm:$0xff] %v375_v54 }
  0xc3 PF:  { %s592_s15 = smov [#allocation14]   ;;  %s593_s17 = smov [#allocation15]  }
  0xc4   :  { %s386_s16 = sshll.u32 %s592_s15, 4  ;;  %s396_s18 = sshll.u32 %s593_s17, 4  ;;  %s387_s16 = int_to_ptr.vmem [resolvable:$true] %s386_s16  ;;  %s397_s18 = int_to_ptr.vmem [resolvable:$true] %s396_s18 }
  0xc5   :  { %s524_s19 = scalar_lea.vmem %s387_s16, 128  ;;  %p529_p0 = scmp.lt.s32.totalorder %s387_s16, %s387_s16 }
  0xc6   :  { %p525_p13 = scmp.ne.s32.totalorder %s387_s16, %s524_s19  ;;  %p530_p1 = scmp.lt.s32.totalorder %s524_s19, %s524_s19 }
  0xc8   :  { %p531_p2 = por %p530_p1, %p529_p0 }
  0xca   :  { %p532_p3 = pnand %p531_p2, %p525_p13 }
  0xcc   :  { %535 = shalt.err (!%p532_p3)
}
  0xcd   :  { %s536_s22 = scalar_lea.hbm %s890_s7, 128 }
  0xce   :  { %p537_p4 = scmp.ne.s32.totalorder %s890_s7, %s536_s22  ;;  %p540_p5 = scmp.lt.u32.totalorder %s536_s22, %s890_s7 }
  0xd0   :  { %p542_p6 = pnand %p540_p5, %p537_p4 }
  0xd2   :  { %545 = shalt.err (!%p542_p6)
}
  0xd3   :  { %389 = dma.vmem_to_hbm [thread:$0]  %s387_s16, 128, %s890_s7, [#allocation4]  }
  0xd4   :  { %s546_s1 = scalar_lea.vmem %s397_s18, 128  ;;  %p551_p8 = scmp.lt.s32.totalorder %s397_s18, %s397_s18 }
  0xd5   :  { %p547_p7 = scmp.ne.s32.totalorder %s397_s18, %s546_s1  ;;  %p552_p9 = scmp.lt.s32.totalorder %s546_s1, %s546_s1 }
  0xd7   :  { %p553_p10 = por %p552_p9, %p551_p8 }
  0xd9   :  { %p554_p11 = pnand %p553_p10, %p547_p7 }
  0xdb   :  { %557 = shalt.err (!%p554_p11)
}
  0xdc   :  { %s558_s27 = scalar_lea.hbm %s891_s8, 128 }
  0xdd   :  { %p559_p12 = scmp.ne.s32.totalorder %s891_s8, %s558_s27  ;;  %p562_p13 = scmp.lt.u32.totalorder %s558_s27, %s891_s8 }
  0xdf   :  { %p564_p0 = pnand %p562_p13, %p559_p12 }
  0xe1   :  { %567 = shalt.err (!%p564_p0)
}
  0xe2   :  { %399 = dma.vmem_to_hbm [thread:$0]  %s397_s18, 128, %s891_s8, [#allocation16]  }
  0xe3   :  { %578 = dma.done.wait [#allocation4], 128  }
  0xe4   :  { %579 = vsyncadd [#allocation4], 4294967168 }
  0xe5   :  { %580 = dma.done.wait [#allocation16], 128  }
  0xe6   :  { %581 = vsyncadd [#allocation16], 4294967168 }
  0xe7   :  { %406 = vsyncpa [#allocation3], 1 }
  0xe8   :  { %407 = vsyncpa [#allocation4], 1 }
  0xe9   :  { %408 = vsyncpa [#allocation16], 1 }
  0xea   :  { %409 = vsyncpa [#allocation5], 1 }
  0xeb   :  { %410 = vsyncpa [#allocation6], 1 }
  0xec   :  { %411 = vsyncpa [#allocation9], 1 }
  0xed   :  { %412 = vsyncpa [#allocation12], 1 }

</bundles_post_ra>
